<compile_context>
chip_gen: v5e
topology: v5e:2x2
jax: 0.10.0
libtpu: 0.0.40
codegen_flags: <defaults>
</compile_context>

<pallas_src>
import math
from functools import partial

import jax
import jax.numpy as jnp
from jax import lax
from jax.experimental import pallas as pl
from jax.experimental.pallas import tpu as pltpu


def _attention_block_kernel(x_ref, kv_ref, wq_ref, wk_ref, wv_ref, o_ref, *,
                            batch, seq_q, seq_kv, scale, compute_dtype):
    """x_ref: (B*Sq, Dv), kv_ref: (B*Skv, Dv), wq/wk: (Dv, Da), wv: (Dv, Dv)."""
    x = x_ref[...].astype(compute_dtype)
    kvx = kv_ref[...].astype(compute_dtype)
    wq = wq_ref[...].astype(compute_dtype)
    wk = wk_ref[...].astype(compute_dtype)
    wv = wv_ref[...].astype(compute_dtype)

    # Batched projections: one MXU pass over all rows of all batches.
    # Scale is folded into q (cheaper than scaling the (Sq, Skv) scores).
    q = jnp.dot(x, wq, preferred_element_type=jnp.float32) * scale     # (B*Sq, Da)
    k = jnp.dot(kvx, wk, preferred_element_type=jnp.float32)           # (B*Skv, Da)
    v = jnp.dot(kvx, wv, preferred_element_type=jnp.float32)           # (B*Skv, Dv)

    q = q.astype(compute_dtype)
    k = k.astype(compute_dtype)
    v = v.astype(compute_dtype)

    # Per-batch attention. `batch` is a small static constant -> unrolled.
    for b in range(batch):
        qb = q[b * seq_q:(b + 1) * seq_q]            # (Sq, Da)
        kb = k[b * seq_kv:(b + 1) * seq_kv]          # (Skv, Da)
        vb = v[b * seq_kv:(b + 1) * seq_kv]          # (Skv, Dv)

        # Q @ K^T with the transpose fused into the matmul (contract last dims).
        s = lax.dot_general(
            qb, kb,
            dimension_numbers=(((1,), (1,)), ((), ())),
            preferred_element_type=jnp.float32)                        # (Sq, Skv)

        # Numerically stable softmax; divide -> approx reciprocal (EUP slot).
        m = jnp.max(s, axis=-1, keepdims=True)
        e = jnp.exp(s - m)
        inv = pl.reciprocal(jnp.sum(e, axis=-1, keepdims=True), approx=True)
        p = (e * inv).astype(compute_dtype)

        ob = jnp.dot(p, vb, preferred_element_type=jnp.float32)        # (Sq, Dv)
        o_ref[b * seq_q:(b + 1) * seq_q, :] = ob.astype(o_ref.dtype)


def attention_block(x, wq_t, wk_t, wv_t, kv=None, *, compute_dtype=jnp.float32):
    """x: (B, Sq, Dv); wq_t/wk_t: (Dv, Da); wv_t: (Dv, Dv); kv: (B, Skv, Dv) | None.

    Weights are stored transposed, i.e. (in_dim, out_dim), so the kernel computes
    x @ W directly — equivalent to PyTorch nn.Linear(bias=False) with weight (out, in).
    """
    if kv is None:
        kv = x
    B, Sq, Dv = x.shape
    Bk, Skv, Dvk = kv.shape
    assert (Bk, Dvk) == (B, Dv)
    Da = wq_t.shape[1]

    # Row-major reshapes are free; lets the kernel run dense (B*S, Dv) matmuls.
    x2d = x.reshape(B * Sq, Dv)
    kv2d = kv.reshape(B * Skv, Dv)

    kernel = partial(
        _attention_block_kernel,
        batch=B, seq_q=Sq, seq_kv=Skv,
        scale=1.0 / math.sqrt(float(Da)),
        compute_dtype=compute_dtype)

    vmem = pl.BlockSpec(memory_space=pltpu.MemorySpace.VMEM)
    out2d = pl.pallas_call(
        kernel,
        out_shape=jax.ShapeDtypeStruct((B * Sq, Dv), x.dtype),
        in_specs=[vmem] * 5,
        out_specs=vmem,
    )(x2d, kv2d, wq_t, wk_t, wv_t)

    return out2d.reshape(B, Sq, Dv)


def attention_block_ref(x, wq_t, wk_t, wv_t, kv=None):
    """Pure-JAX reference mirroring the PyTorch forward."""
    if kv is None:
        kv = x
    q = x @ wq_t
    k = kv @ wk_t
    v = kv @ wv_t
    scores = jnp.einsum("bqd,bkd->bqk", q, k) / jnp.sqrt(
        jnp.asarray(q.shape[-1], jnp.float32))
    p = jax.nn.softmax(scores, axis=-1)
    return jnp.einsum("bqk,bkd->bqd", p, v)


if __name__ == "__main__":
    # Shapes consistent with the module: x (batch=2, seq=8, dim_val=32), dim_attn=16.
    B, S, dim_val, dim_attn = 2, 8, 32, 16
    S_kv = 16  # cross-attention test uses a different kv sequence length

    key = jax.random.PRNGKey(0)
    k_x, k_kv, k_q, k_k, k_v = jax.random.split(key, 5)

    x = jax.random.normal(k_x, (B, S, dim_val), dtype=jnp.float32)
    kv_in = jax.random.normal(k_kv, (B, S_kv, dim_val), dtype=jnp.float32)

    # Deterministic "nn.Linear(bias=False)" weights, stored transposed (in, out).
    bound = 1.0 / math.sqrt(dim_val)
    wq_t = jax.random.uniform(k_q, (dim_val, dim_attn), jnp.float32, -bound, bound)
    wk_t = jax.random.uniform(k_k, (dim_val, dim_attn), jnp.float32, -bound, bound)
    wv_t = jax.random.uniform(k_v, (dim_val, dim_val), jnp.float32, -bound, bound)

    # --- self-attention (kv=None), f32 operands ---
    out = jax.block_until_ready(attention_block(x, wq_t, wk_t, wv_t))
    ref = attention_block_ref(x, wq_t, wk_t, wv_t)
    assert out.shape == (B, S, dim_val)
    assert jnp.allclose(out, ref, atol=2e-3, rtol=2e-3), "self-attn f32 mismatch"

    # --- cross-attention (kv given), f32 operands ---
    out_x = jax.block_until_ready(attention_block(x, wq_t, wk_t, wv_t, kv=kv_in))
    ref_x = attention_block_ref(x, wq_t, wk_t, wv_t, kv=kv_in)
    assert out_x.shape == (B, S, dim_val)
    assert jnp.allclose(out_x, ref_x, atol=2e-3, rtol=2e-3), "cross-attn f32 mismatch"

    # --- bf16 MXU operands, f32 accumulation (v6e/v7x fast path) ---
    out_bf = jax.block_until_ready(
        attention_block(x, wq_t, wk_t, wv_t, compute_dtype=jnp.bfloat16))
    assert jnp.allclose(out_bf, ref, atol=5e-2, rtol=5e-2), "self-attn bf16 mismatch"

    print("KERNEL_OK")
</pallas_src>

<mosaic_0001>
module attributes {stable_mosaic.version = 11 : i64} {
  func.func @_attention_block_kernel(%arg0: memref<16x32xf32, #tpu.memory_space<vmem>>, %arg1: memref<16x32xf32, #tpu.memory_space<vmem>>, %arg2: memref<32x16xf32, #tpu.memory_space<vmem>>, %arg3: memref<32x16xf32, #tpu.memory_space<vmem>>, %arg4: memref<32x32xf32, #tpu.memory_space<vmem>>, %arg5: memref<16x32xf32, #tpu.memory_space<vmem>>) attributes {dimension_semantics = [], scalar_prefetch = 0 : i64, scratch_operands = 0 : i64, tpu.core_type = #tpu.core_type<tc>} {
    %c0 = arith.constant 0 : index
    %c0_0 = arith.constant 0 : index
    %0 = vector.load %arg0[%c0, %c0_0] : memref<16x32xf32, #tpu.memory_space<vmem>>, vector<16x32xf32>
    %c0_1 = arith.constant 0 : index
    %c0_2 = arith.constant 0 : index
    %1 = vector.load %arg1[%c0_1, %c0_2] : memref<16x32xf32, #tpu.memory_space<vmem>>, vector<16x32xf32>
    %c0_3 = arith.constant 0 : index
    %c0_4 = arith.constant 0 : index
    %2 = vector.load %arg2[%c0_3, %c0_4] : memref<32x16xf32, #tpu.memory_space<vmem>>, vector<32x16xf32>
    %c0_5 = arith.constant 0 : index
    %c0_6 = arith.constant 0 : index
    %3 = vector.load %arg3[%c0_5, %c0_6] : memref<32x16xf32, #tpu.memory_space<vmem>>, vector<32x16xf32>
    %c0_7 = arith.constant 0 : index
    %c0_8 = arith.constant 0 : index
    %4 = vector.load %arg4[%c0_7, %c0_8] : memref<32x32xf32, #tpu.memory_space<vmem>>, vector<32x32xf32>
    %cst = arith.constant dense<0.000000e+00> : vector<16x16xf32>
    %5 = tpu.matmul %0, %2, %cst {dimension_numbers = #tpu.dot_dimension_numbers<[1], [0], [0], [1], [0, 0, 1, 1], [], []>} : vector<16x32xf32>, vector<32x16xf32>, vector<16x16xf32> -> vector<16x16xf32>
    %cst_9 = arith.constant 2.500000e-01 : f32
    %6 = vector.broadcast %cst_9 : f32 to vector<16x16xf32>
    %7 = arith.mulf %5, %6 : vector<16x16xf32>
    %cst_10 = arith.constant dense<0.000000e+00> : vector<16x16xf32>
    %8 = tpu.matmul %1, %3, %cst_10 {dimension_numbers = #tpu.dot_dimension_numbers<[1], [0], [0], [1], [0, 0, 1, 1], [], []>} : vector<16x32xf32>, vector<32x16xf32>, vector<16x16xf32> -> vector<16x16xf32>
    %cst_11 = arith.constant dense<0.000000e+00> : vector<16x32xf32>
    %9 = tpu.matmul %1, %4, %cst_11 {dimension_numbers = #tpu.dot_dimension_numbers<[1], [0], [0], [1], [0, 0, 1, 1], [], []>} : vector<16x32xf32>, vector<32x32xf32>, vector<16x32xf32> -> vector<16x32xf32>
    %10 = vector.extract_strided_slice %7 {offsets = [0, 0], sizes = [8, 16], strides = [1, 1]} : vector<16x16xf32> to vector<8x16xf32>
    %11 = vector.extract_strided_slice %8 {offsets = [0, 0], sizes = [8, 16], strides = [1, 1]} : vector<16x16xf32> to vector<8x16xf32>
    %12 = vector.extract_strided_slice %9 {offsets = [0, 0], sizes = [8, 32], strides = [1, 1]} : vector<16x32xf32> to vector<8x32xf32>
    %cst_12 = arith.constant dense<0.000000e+00> : vector<8x8xf32>
    %13 = tpu.matmul %10, %11, %cst_12 {dimension_numbers = #tpu.dot_dimension_numbers<[1], [1], [0], [0], [0, 0, 1, 0], [], []>} : vector<8x16xf32>, vector<8x16xf32>, vector<8x8xf32> -> vector<8x8xf32>
    %cst_13 = arith.constant dense<0xFF800000> : vector<8xf32>
    %14 = vector.multi_reduction <maximumf>, %13, %cst_13 [1] : vector<8x8xf32> to vector<8xf32>
    %15 = vector.shape_cast %14 : vector<8xf32> to vector<8x1xf32>
    %16 = vector.broadcast %15 : vector<8x1xf32> to vector<8x8xf32>
    %17 = arith.subf %13, %16 : vector<8x8xf32>
    %18 = math.exp %17 : vector<8x8xf32>
    %cst_14 = arith.constant dense<0.000000e+00> : vector<8xf32>
    %19 = vector.multi_reduction <add>, %18, %cst_14 [1] : vector<8x8xf32> to vector<8xf32>
    %20 = vector.shape_cast %19 : vector<8xf32> to vector<8x1xf32>
    %21 = tpu.reciprocal %20 {approx = true} : vector<8x1xf32> -> vector<8x1xf32>
    %22 = vector.broadcast %21 : vector<8x1xf32> to vector<8x8xf32>
    %23 = arith.mulf %18, %22 : vector<8x8xf32>
    %cst_15 = arith.constant dense<0.000000e+00> : vector<8x32xf32>
    %24 = tpu.matmul %23, %12, %cst_15 {dimension_numbers = #tpu.dot_dimension_numbers<[1], [0], [0], [1], [0, 0, 1, 1], [], []>} : vector<8x8xf32>, vector<8x32xf32>, vector<8x32xf32> -> vector<8x32xf32>
    %c0_16 = arith.constant 0 : index
    %c0_17 = arith.constant 0 : index
    %25 = vector.load %arg5[%c0_16, %c0_17] : memref<16x32xf32, #tpu.memory_space<vmem>>, vector<8x32xf32>
    tpu.vector_store %arg5[%c0_16, %c0_17], %24 {strides = array<i32>} : memref<16x32xf32, #tpu.memory_space<vmem>>, vector<8x32xf32>,
    %26 = vector.extract_strided_slice %7 {offsets = [8, 0], sizes = [8, 16], strides = [1, 1]} : vector<16x16xf32> to vector<8x16xf32>
    %27 = vector.extract_strided_slice %8 {offsets = [8, 0], sizes = [8, 16], strides = [1, 1]} : vector<16x16xf32> to vector<8x16xf32>
    %28 = vector.extract_strided_slice %9 {offsets = [8, 0], sizes = [8, 32], strides = [1, 1]} : vector<16x32xf32> to vector<8x32xf32>
    %cst_18 = arith.constant dense<0.000000e+00> : vector<8x8xf32>
    %29 = tpu.matmul %26, %27, %cst_18 {dimension_numbers = #tpu.dot_dimension_numbers<[1], [1], [0], [0], [0, 0, 1, 0], [], []>} : vector<8x16xf32>, vector<8x16xf32>, vector<8x8xf32> -> vector<8x8xf32>
    %cst_19 = arith.constant dense<0xFF800000> : vector<8xf32>
    %30 = vector.multi_reduction <maximumf>, %29, %cst_19 [1] : vector<8x8xf32> to vector<8xf32>
    %31 = vector.shape_cast %30 : vector<8xf32> to vector<8x1xf32>
    %32 = vector.broadcast %31 : vector<8x1xf32> to vector<8x8xf32>
    %33 = arith.subf %29, %32 : vector<8x8xf32>
    %34 = math.exp %33 : vector<8x8xf32>
    %cst_20 = arith.constant dense<0.000000e+00> : vector<8xf32>
    %35 = vector.multi_reduction <add>, %34, %cst_20 [1] : vector<8x8xf32> to vector<8xf32>
    %36 = vector.shape_cast %35 : vector<8xf32> to vector<8x1xf32>
    %37 = tpu.reciprocal %36 {approx = true} : vector<8x1xf32> -> vector<8x1xf32>
    %38 = vector.broadcast %37 : vector<8x1xf32> to vector<8x8xf32>
    %39 = arith.mulf %34, %38 : vector<8x8xf32>
    %cst_21 = arith.constant dense<0.000000e+00> : vector<8x32xf32>
    %40 = tpu.matmul %39, %28, %cst_21 {dimension_numbers = #tpu.dot_dimension_numbers<[1], [0], [0], [1], [0, 0, 1, 1], [], []>} : vector<8x8xf32>, vector<8x32xf32>, vector<8x32xf32> -> vector<8x32xf32>
    %c8 = arith.constant 8 : index
    %c0_22 = arith.constant 0 : index
    %41 = vector.load %arg5[%c8, %c0_22] : memref<16x32xf32, #tpu.memory_space<vmem>>, vector<8x32xf32>
    tpu.vector_store %arg5[%c8, %c0_22], %40 {strides = array<i32>} : memref<16x32xf32, #tpu.memory_space<vmem>>, vector<8x32xf32>,
    return
  }
}

</mosaic_0001>

<bundles_post_ra>
// kernel: tpu_custom_call.1
= control target key start
LH: loop header
LB: loop body
LE: loop exit
PB: predicated region body
PF: predicated region fallthrough
CT: control target
= control target key end

     0   :  { %s414_s0 = inlined_call_operand.vmem [shape: f32[16,32], index: 0, kind: input, shape index: {}]   ;;  %s415_s1 = inlined_call_operand.vmem [shape: f32[16,32], index: 1, kind: input, shape index: {}]   ;;  %s416_s2 = inlined_call_operand.vmem [shape: f32[32,16], index: 2, kind: input, shape index: {}]   ;;  %s417_s3 = inlined_call_operand.vmem [shape: f32[32,16], index: 3, kind: input, shape index: {}]   ;;  %s418_s4 = inlined_call_operand.vmem [shape: f32[32,32], index: 4, kind: input, shape index: {}]   ;;  %s419_s5 = inlined_call_operand.hbm [shape: f32[16,32], index: 5, kind: output, shape index: {}]  }
   0x1   :  { %v32_v0 = vld [vmem:[%s417_s3 + $0x18] sm:$0xff]  ;;  %v31_v2 = vld [vmem:[%s417_s3 + $0x10] sm:$0xff]  ;;  %v30_v4 = vld [vmem:[%s417_s3 + $0x8] sm:$0xff] }
   0x2   :  { %v28_v1 = vld [vmem:[%s416_s2 + $0x18] sm:$0xff]  ;;  %87 = vmatpush.msra.mxu1 %v32_v0  ;;  %v27_v3 = vld [vmem:[%s416_s2 + $0x10] sm:$0xff]  ;;  %v26_v5 = vld [vmem:[%s416_s2 + $0x8] sm:$0xff] }
   0x3   :  { %56 = vmatpush.msra.mxu0 %v28_v1 }
   0x4   :  { %88 = vmatpush.msra.mxu1 %v31_v2 }
   0x5   :  { %57 = vmatpush.msra.mxu0 %v27_v3 }
   0x6   :  { %10 = vsyncpa [#allocation3], 0  ;;  %v29_v6 = vld [vmem:[%s417_s3] sm:$0xff]  ;;  %89 = vmatpush.msra.mxu1 %v30_v4  ;;  %vm37_vm0 = vcmask 261120   ;;  %vm121_vm1 = vcmask 130048   ;;  %v36_v13 = vld [vmem:[%s418_s4 + $0x18] sm:$0xff] }
   0x7   :  { %v25_v7 = vld [vmem:[%s416_s2] sm:$0xff]  ;;  %58 = vmatpush.msra.mxu0 %v26_v5  ;;  %v35_v14 = vld [vmem:[%s418_s4 + $0x10] sm:$0xff]  ;;  %110 = vmatpush.msra.mxu2 %v36_v13  ;;  %v34_v15 = vld [vmem:[%s418_s4 + $0x8] sm:$0xff]  ;;  %vm148_vm2 = vcmask 64512   ;;  %s251_s24 = sshll.u32 %s419_s5, 4  ;;  %s313_s25 = smov 128   ;;  %s252_s24 = int_to_ptr.hbm [resolvable:$true] %s251_s24 }
   0x8   :  { %v23_v8 = vld [vmem:[%s415_s1] sm:$0xff]  ;;  %90 = vmatpush.msra.mxu1 %v29_v6  ;;  %v24_v19 = vld [vmem:[%s415_s1 + $0x8] sm:$0xff]  ;;  %s314_s26 = smov 8  }
   0x9   :  { %v21_v9 = vld [vmem:[%s414_s0] sm:$0xff]  ;;  %59 = vmatpush.msra.mxu0 %v25_v7  ;;  %265 = vmatmul.msk.f32.vlgmr.msra.gmra.mxu1 %vm37_vm0, %v23_v8  ;;  %v22_v20 = vld [vmem:[%s414_s0 + $0x8] sm:$0xff]  ;;  %s312_s0 = smov [#allocation2]  }
   0xa   :  { %263 = vmatmul.msk.f32.vlgmr.msra.gmra.mxu0 %vm37_vm0, %v21_v9  ;;  %111 = vmatpush.msra.mxu2 %v35_v14  ;;  %v33_v16 = vld [vmem:[%s418_s4] sm:$0xff]  ;;  %s249_s1 = sshll.u32 %s312_s0, 4  ;;  %s250_s1 = int_to_ptr.vmem [resolvable:$true] %s249_s1 }
   0xc   :  { %112 = vmatpush.msra.mxu2 %v34_v15 }
   0xe   :  { %113 = vmatpush.msra.mxu2 %v33_v16 }
   0xf   :  { %267 = vmatmul.msk.f32.vlgmr.msra.gmra.mxu2 %vm37_vm0, %v23_v8 }
  0x11   :  { %266 = vmatmul.msk.f32.gmra.mxu1 %vm37_vm0, %v24_v19 }
  0x12   :  { %264 = vmatmul.msk.f32.gmra.mxu0 %vm37_vm0, %v22_v20 }
  0x17   :  { %268 = vmatmul.msk.f32.gmra.mxu2 %vm37_vm0, %v24_v19 }
  0x86   :  { %v92_v10 = vpop.f32.mrf.mxu1 }
  0x87   :  { %v61_v11 = vpop.f32.mrf.mxu0  ;;  %269 = vmatpush.xpose.msk.msra.mxu3 %vm121_vm1, %v92_v10 }
  0x88   :  { %v67_v12 = vmul.f32 0.25, %v61_v11 }
  0x8a   :  { %270 = vmatmul.msk.f32.vlgmr.msra.gmra.mxu3 %vm121_vm1, %v67_v12 }
  0x8e   :  { %v95_v27 = vpop.f32.mrf.mxu1 }
  0x8f   :  { %v64_v31 = vpop.f32.mrf.mxu0 }
  0x90   :  { %v68_v32 = vmul.f32 0.25, %v64_v31 }
  0x92   :  { %v115_v26 = vpop.f32.mrf.mxu2 }
  0x93   :  { %178 = vmatpush.msrb.mxu3 %v115_v26 }
  0x95   :  { %272 = vmatpush.xpose.msk.msra.mxu3 %vm121_vm1, %v95_v27 }
  0x9a   :  { %v118_v36 = vpop.f32.mrf.mxu2 }
  0x9b   :  { %239 = vmatpush.msrb.mxu0 %v118_v36 }
 0x10d   :  { %v145_v17 = vpop.f32.mrf.mxu3 }
 0x10e   :  { %v149_v18 = vsel %vm148_vm2, %v145_v17, -inf }
 0x10f   :  { %150 = vmax.xlane.f32.xlu0 %v149_v18 }
 0x182   :  { %v151_v21 = vpop.xlane.xlu0 %150 }
 0x183   :  { %v152_v22 = vsub.f32 %v145_v17, %v151_v21 }
 0x185   :  { %v153_v23 = vmul.f32 1.442695, %v152_v22 }
 0x187   :  { %278 = vpow2.f32 %v153_v23 }
 0x18d   :  { %v279_v24 = vpop.eup %278 }
 0x18e   :  { %v155_v25 = vsel %vm148_vm2, %v279_v24, 0.0 }
 0x18f   :  { %156 = vadd.xlane.f32.xlu0 %v155_v25 }
 0x202   :  { %v157_v28 = vpop.xlane.xlu0 %156 }
 0x203   :  { %280 = vrcp.f32 %v157_v28 }
 0x209   :  { %v281_v29 = vpop.eup %280 }
 0x20a   :  { %v159_v30 = vmul.f32 %v281_v29, %v279_v24 }
 0x20c   :  { %271 = vmatmul.msk.f32.vlgmr.msrb.gmra.mxu3 %vm148_vm2, %v159_v30 }
 0x214   :  { %273 = vmatmul.msk.f32.vlgmr.msra.gmra.mxu3 %vm121_vm1, %v68_v32 }
 0x28f   :  { %v180_v33 = vpop.f32.mrf.mxu3 }
 0x290   :  { %183 = vst.msk [vmem:[#allocation2] sm:$0xff] %vm37_vm0, %v180_v33 }
 0x297   :  { %v207_v34 = vpop.f32.mrf.mxu3 }
 0x298   :  { %v210_v35 = vsel %vm148_vm2, %v207_v34, -inf }
 0x299   :  { %211 = vmax.xlane.f32.xlu1 %v210_v35 }
 0x30c   :  { %v212_v37 = vpop.xlane.xlu1 %211 }
 0x30d   :  { %v213_v38 = vsub.f32 %v207_v34, %v212_v37 }
 0x30f   :  { %v214_v39 = vmul.f32 1.442695, %v213_v38 }
 0x311   :  { %282 = vpow2.f32 %v214_v39 }
 0x317   :  { %v283_v40 = vpop.eup %282 }
 0x318   :  { %v216_v41 = vsel %vm148_vm2, %v283_v40, 0.0 }
 0x319   :  { %217 = vadd.xlane.f32.xlu1 %v216_v41 }
 0x38c   :  { %v218_v42 = vpop.xlane.xlu1 %217 }
 0x38d   :  { %284 = vrcp.f32 %v218_v42 }
 0x393   :  { %v285_v43 = vpop.eup %284 }
 0x394   :  { %v220_v44 = vmul.f32 %v285_v43, %v283_v40 }
 0x396   :  { %274 = vmatmul.msk.f32.vlgmr.msrb.gmra.mxu0 %vm148_vm2, %v220_v44 }
 0x413   :  { %v241_v45 = vpop.f32.mrf.mxu0 }
 0x414   :  { %244 = vst.msk [vmem:[#allocation2 + $0x8] sm:$0xff] %vm37_vm0, %v241_v45 }
 0x415   :  { %257 = dma.vmem_to_hbm [thread:$0]  %s250_s1, 256, %s252_s24, [#allocation3], %s313_s25, %s313_s25, %s314_s26  }
 0x416   :  { %310 = dma.done.wait [#allocation3], 256  }
 0x417   :  { %311 = vsyncadd [#allocation3], 4294967040 }
 0x418   :  { %262 = vsyncpa [#allocation3], 1 }

</bundles_post_ra>
